<compile_context>
chip_gen: v7x
topology: tpu7x:2x2x1
jax: 0.10.0
libtpu: 0.0.40
codegen_flags: <defaults>
</compile_context>

<pallas_src>
import functools

import jax
import jax.numpy as jnp
from jax import lax
from jax.experimental import pallas as pl
from jax.experimental.pallas import tpu as pltpu


def _maxpool3x3s2_kernel(x_ref, o_ref, *, Ho, Wsel):
    """One (n, c-block) step.

    x_ref: (1, C_BLK, H, W) input block.
    o_ref: (1, C_BLK, Ho * Wsel) lane-dense output block holding the horizontal
           3-tap max at EVERY column offset (stride-2 decimation happens in the
           wrapper on this small array).
    """
    # Unrolled over output rows (Ho is small: 7 for 16x16, 17 for 35x35 inputs).
    # Every access below is a static, contiguous slice; all math is VPU maxes
    # in the input dtype.
    for i in range(Ho):
        win = x_ref[0, :, 2 * i:2 * i + 3, :]            # (C_BLK, 3, W)
        v = jnp.max(win, axis=1)                         # vertical 3-tap (C_BLK, W)
        h = jnp.maximum(jnp.maximum(v[:, 0:Wsel], v[:, 1:Wsel + 1]),
                        v[:, 2:Wsel + 2])                # horizontal 3-tap (C_BLK, Wsel)
        o_ref[0, :, i * Wsel:(i + 1) * Wsel] = h


def _vmem_capacity_bytes():
    """Physical VMEM of the local TPU; conservative v7x fallback (64 MiB)."""
    try:
        return int(pltpu.get_tpu_info().vmem_capacity_bytes)
    except Exception:
        return 64 * 1024 * 1024


def _pick_c_block(N, C, H, W, L, itemsize, cap):
    """Channel-block size: big enough to amortize per-step overhead, small enough
    to fit double-buffered input+output blocks in VMEM, and keeping >= 4 grid
    steps when possible.  Returned value is C itself or a multiple of 8."""
    pad = lambda v, m: -(-v // m) * m
    sub = max(8, 32 // itemsize)                          # f32 -> 8, bf16 -> 16
    per_ch = pad(H, sub) * pad(W, 128) * itemsize + pad(L, 128) * itemsize
    budget = min(cap // 6, 16 * 1024 * 1024)              # per (single) block pair
    cb = max(1, budget // per_ch)
    min_c_blocks = max(1, -(-4 // N))                     # want >= 4 total grid steps
    cb = min(cb, -(-C // min_c_blocks))
    if cb >= C:
        return C
    return min(C, max(8, (cb // 8) * 8))                  # out-block sublane alignment


def max_pool_branch(x):
    """Forward of MaxPoolBranch: nn.MaxPool2d(kernel_size=3, stride=2, padding=0).

    x: (N, C, H, W). Returns (N, C, (H-3)//2 + 1, (W-3)//2 + 1), same dtype.
    """
    N, C, H, W = x.shape
    assert H >= 3 and W >= 3, "spatial dims must be >= kernel size (3)"
    Ho = (H - 3) // 2 + 1
    Wo = (W - 3) // 2 + 1
    Wsel = 2 * Wo - 1                                     # all column offsets we emit
    L = Ho * Wsel
    itemsize = jnp.dtype(x.dtype).itemsize

    cap = _vmem_capacity_bytes()
    C_BLK = _pick_c_block(N, C, H, W, L, itemsize, cap)
    grid = (N, pl.cdiv(C, C_BLK))

    # Explicit VMEM limit: 2x double-buffered input block + 2x output block + margin.
    pad = lambda v, m: -(-v // m) * m
    sub = max(8, 32 // itemsize)
    in_blk = C_BLK * pad(H, sub) * pad(W, 128) * itemsize
    out_blk = pad(C_BLK, sub) * pad(L, 128) * itemsize
    need = 2 * (in_blk + out_blk)
    vmem_limit = min(int(0.75 * cap), max(32 * 1024 * 1024, need + (8 << 20)))

    kernel = functools.partial(_maxpool3x3s2_kernel, Ho=Ho, Wsel=Wsel)

    y_flat = pl.pallas_call(
        kernel,
        out_shape=jax.ShapeDtypeStruct((N, C, L), x.dtype),
        grid_spec=pltpu.PrefetchScalarGridSpec(
            num_scalar_prefetch=0,
            grid=grid,
            in_specs=[pl.BlockSpec((1, C_BLK, H, W), lambda n, c: (n, c, 0, 0))],
            out_specs=pl.BlockSpec((1, C_BLK, L), lambda n, c: (n, c, 0)),
        ),
        compiler_params=pltpu.CompilerParams(
            dimension_semantics=("parallel", "parallel"),
            vmem_limit_bytes=vmem_limit,
        ),
    )(x)

    # Stride-2 column decimation on the small kernel output (exact; plain XLA op
    # on ~2x the final output bytes, fuses into downstream consumers under jit).
    return y_flat.reshape(N, C, Ho, Wsel)[..., ::2]


if __name__ == "__main__":
    # MaxPoolBranch has no learnable parameters, so nothing to initialize.
    key = jax.random.PRNGKey(0)
    x = jax.random.normal(key, (2, 4, 16, 16), dtype=jnp.float32)

    out = jax.block_until_ready(max_pool_branch(x))

    # Pure-JAX reference (same semantics as torch MaxPool2d(3, 2, 0)).
    ref = lax.reduce_window(x, -jnp.inf, lax.max,
                            window_dimensions=(1, 1, 3, 3),
                            window_strides=(1, 1, 2, 2),
                            padding="VALID")
    assert out.shape == ref.shape == (2, 4, 7, 7), (out.shape, ref.shape)
    assert out.dtype == x.dtype
    assert jnp.allclose(out, ref), "mismatch vs reference"
    print("KERNEL_OK")
</pallas_src>

<mosaic_0001>
module attributes {stable_mosaic.version = 11 : i64} {
  func.func @_maxpool3x3s2_kernel(%arg0: i32, %arg1: i32, %arg2: memref<1x4x16x16xf32, #tpu.memory_space<vmem>>, %arg3: memref<1x4x91xf32, #tpu.memory_space<vmem>>) attributes {dimension_semantics = [#tpu.dimension_semantics<parallel>, #tpu.dimension_semantics<parallel>], iteration_bounds = array<i64: 2, 1>, scalar_prefetch = 0 : i64, scratch_operands = 0 : i64, tpu.core_type = #tpu.core_type<tc>, window_params = [{transform_indices = @transform_0, window_bounds = array<i64: 1, 4, 16, 16>}, {transform_indices = @transform_1, window_bounds = array<i64: 1, 4, 91>}]} {
    %c0 = arith.constant 0 : index
    %c0_0 = arith.constant 0 : index
    %c0_1 = arith.constant 0 : index
    %c0_2 = arith.constant 0 : index
    %0 = vector.load %arg2[%c0, %c0_0, %c0_1, %c0_2] : memref<1x4x16x16xf32, #tpu.memory_space<vmem>>, vector<1x4x3x16xf32>
    %1 = vector.shape_cast %0 : vector<1x4x3x16xf32> to vector<4x3x16xf32>
    %cst = arith.constant dense<0xFF800000> : vector<4x16xf32>
    %2 = vector.multi_reduction <maximumf>, %1, %cst [1] : vector<4x3x16xf32> to vector<4x16xf32>
    %3 = vector.extract_strided_slice %2 {offsets = [0, 0], sizes = [4, 13], strides = [1, 1]} : vector<4x16xf32> to vector<4x13xf32>
    %4 = vector.extract_strided_slice %2 {offsets = [0, 1], sizes = [4, 13], strides = [1, 1]} : vector<4x16xf32> to vector<4x13xf32>
    %5 = arith.maximumf %3, %4 : vector<4x13xf32>
    %6 = vector.extract_strided_slice %2 {offsets = [0, 2], sizes = [4, 13], strides = [1, 1]} : vector<4x16xf32> to vector<4x13xf32>
    %7 = arith.maximumf %5, %6 : vector<4x13xf32>
    %c0_3 = arith.constant 0 : index
    %c0_4 = arith.constant 0 : index
    %c0_5 = arith.constant 0 : index
    %8 = vector.load %arg3[%c0_3, %c0_4, %c0_5] : memref<1x4x91xf32, #tpu.memory_space<vmem>>, vector<1x4x13xf32>
    %9 = vector.shape_cast %8 : vector<1x4x13xf32> to vector<4x13xf32>
    %10 = vector.shape_cast %7 : vector<4x13xf32> to vector<1x4x13xf32>
    tpu.vector_store %arg3[%c0_3, %c0_4, %c0_5], %10 {strides = array<i32>} : memref<1x4x91xf32, #tpu.memory_space<vmem>>, vector<1x4x13xf32>,
    %c0_6 = arith.constant 0 : index
    %c0_7 = arith.constant 0 : index
    %c2 = arith.constant 2 : index
    %c0_8 = arith.constant 0 : index
    %11 = vector.load %arg2[%c0_6, %c0_7, %c2, %c0_8] : memref<1x4x16x16xf32, #tpu.memory_space<vmem>>, vector<1x4x3x16xf32>
    %12 = vector.shape_cast %11 : vector<1x4x3x16xf32> to vector<4x3x16xf32>
    %cst_9 = arith.constant dense<0xFF800000> : vector<4x16xf32>
    %13 = vector.multi_reduction <maximumf>, %12, %cst_9 [1] : vector<4x3x16xf32> to vector<4x16xf32>
    %14 = vector.extract_strided_slice %13 {offsets = [0, 0], sizes = [4, 13], strides = [1, 1]} : vector<4x16xf32> to vector<4x13xf32>
    %15 = vector.extract_strided_slice %13 {offsets = [0, 1], sizes = [4, 13], strides = [1, 1]} : vector<4x16xf32> to vector<4x13xf32>
    %16 = arith.maximumf %14, %15 : vector<4x13xf32>
    %17 = vector.extract_strided_slice %13 {offsets = [0, 2], sizes = [4, 13], strides = [1, 1]} : vector<4x16xf32> to vector<4x13xf32>
    %18 = arith.maximumf %16, %17 : vector<4x13xf32>
    %c0_10 = arith.constant 0 : index
    %c0_11 = arith.constant 0 : index
    %c13 = arith.constant 13 : index
    %19 = vector.load %arg3[%c0_10, %c0_11, %c13] : memref<1x4x91xf32, #tpu.memory_space<vmem>>, vector<1x4x13xf32>
    %20 = vector.shape_cast %19 : vector<1x4x13xf32> to vector<4x13xf32>
    %21 = vector.shape_cast %18 : vector<4x13xf32> to vector<1x4x13xf32>
    tpu.vector_store %arg3[%c0_10, %c0_11, %c13], %21 {strides = array<i32>} : memref<1x4x91xf32, #tpu.memory_space<vmem>>, vector<1x4x13xf32>,
    %c0_12 = arith.constant 0 : index
    %c0_13 = arith.constant 0 : index
    %c4 = arith.constant 4 : index
    %c0_14 = arith.constant 0 : index
    %22 = vector.load %arg2[%c0_12, %c0_13, %c4, %c0_14] : memref<1x4x16x16xf32, #tpu.memory_space<vmem>>, vector<1x4x3x16xf32>
    %23 = vector.shape_cast %22 : vector<1x4x3x16xf32> to vector<4x3x16xf32>
    %cst_15 = arith.constant dense<0xFF800000> : vector<4x16xf32>
    %24 = vector.multi_reduction <maximumf>, %23, %cst_15 [1] : vector<4x3x16xf32> to vector<4x16xf32>
    %25 = vector.extract_strided_slice %24 {offsets = [0, 0], sizes = [4, 13], strides = [1, 1]} : vector<4x16xf32> to vector<4x13xf32>
    %26 = vector.extract_strided_slice %24 {offsets = [0, 1], sizes = [4, 13], strides = [1, 1]} : vector<4x16xf32> to vector<4x13xf32>
    %27 = arith.maximumf %25, %26 : vector<4x13xf32>
    %28 = vector.extract_strided_slice %24 {offsets = [0, 2], sizes = [4, 13], strides = [1, 1]} : vector<4x16xf32> to vector<4x13xf32>
    %29 = arith.maximumf %27, %28 : vector<4x13xf32>
    %c0_16 = arith.constant 0 : index
    %c0_17 = arith.constant 0 : index
    %c26 = arith.constant 26 : index
    %30 = vector.load %arg3[%c0_16, %c0_17, %c26] : memref<1x4x91xf32, #tpu.memory_space<vmem>>, vector<1x4x13xf32>
    %31 = vector.shape_cast %30 : vector<1x4x13xf32> to vector<4x13xf32>
    %32 = vector.shape_cast %29 : vector<4x13xf32> to vector<1x4x13xf32>
    tpu.vector_store %arg3[%c0_16, %c0_17, %c26], %32 {strides = array<i32>} : memref<1x4x91xf32, #tpu.memory_space<vmem>>, vector<1x4x13xf32>,
    %c0_18 = arith.constant 0 : index
    %c0_19 = arith.constant 0 : index
    %c6 = arith.constant 6 : index
    %c0_20 = arith.constant 0 : index
    %33 = vector.load %arg2[%c0_18, %c0_19, %c6, %c0_20] : memref<1x4x16x16xf32, #tpu.memory_space<vmem>>, vector<1x4x3x16xf32>
    %34 = vector.shape_cast %33 : vector<1x4x3x16xf32> to vector<4x3x16xf32>
    %cst_21 = arith.constant dense<0xFF800000> : vector<4x16xf32>
    %35 = vector.multi_reduction <maximumf>, %34, %cst_21 [1] : vector<4x3x16xf32> to vector<4x16xf32>
    %36 = vector.extract_strided_slice %35 {offsets = [0, 0], sizes = [4, 13], strides = [1, 1]} : vector<4x16xf32> to vector<4x13xf32>
    %37 = vector.extract_strided_slice %35 {offsets = [0, 1], sizes = [4, 13], strides = [1, 1]} : vector<4x16xf32> to vector<4x13xf32>
    %38 = arith.maximumf %36, %37 : vector<4x13xf32>
    %39 = vector.extract_strided_slice %35 {offsets = [0, 2], sizes = [4, 13], strides = [1, 1]} : vector<4x16xf32> to vector<4x13xf32>
    %40 = arith.maximumf %38, %39 : vector<4x13xf32>
    %c0_22 = arith.constant 0 : index
    %c0_23 = arith.constant 0 : index
    %c39 = arith.constant 39 : index
    %41 = vector.load %arg3[%c0_22, %c0_23, %c39] : memref<1x4x91xf32, #tpu.memory_space<vmem>>, vector<1x4x13xf32>
    %42 = vector.shape_cast %41 : vector<1x4x13xf32> to vector<4x13xf32>
    %43 = vector.shape_cast %40 : vector<4x13xf32> to vector<1x4x13xf32>
    tpu.vector_store %arg3[%c0_22, %c0_23, %c39], %43 {strides = array<i32>} : memref<1x4x91xf32, #tpu.memory_space<vmem>>, vector<1x4x13xf32>,
    %c0_24 = arith.constant 0 : index
    %c0_25 = arith.constant 0 : index
    %c8 = arith.constant 8 : index
    %c0_26 = arith.constant 0 : index
    %44 = vector.load %arg2[%c0_24, %c0_25, %c8, %c0_26] : memref<1x4x16x16xf32, #tpu.memory_space<vmem>>, vector<1x4x3x16xf32>
    %45 = vector.shape_cast %44 : vector<1x4x3x16xf32> to vector<4x3x16xf32>
    %cst_27 = arith.constant dense<0xFF800000> : vector<4x16xf32>
    %46 = vector.multi_reduction <maximumf>, %45, %cst_27 [1] : vector<4x3x16xf32> to vector<4x16xf32>
    %47 = vector.extract_strided_slice %46 {offsets = [0, 0], sizes = [4, 13], strides = [1, 1]} : vector<4x16xf32> to vector<4x13xf32>
    %48 = vector.extract_strided_slice %46 {offsets = [0, 1], sizes = [4, 13], strides = [1, 1]} : vector<4x16xf32> to vector<4x13xf32>
    %49 = arith.maximumf %47, %48 : vector<4x13xf32>
    %50 = vector.extract_strided_slice %46 {offsets = [0, 2], sizes = [4, 13], strides = [1, 1]} : vector<4x16xf32> to vector<4x13xf32>
    %51 = arith.maximumf %49, %50 : vector<4x13xf32>
    %c0_28 = arith.constant 0 : index
    %c0_29 = arith.constant 0 : index
    %c52 = arith.constant 52 : index
    %52 = vector.load %arg3[%c0_28, %c0_29, %c52] : memref<1x4x91xf32, #tpu.memory_space<vmem>>, vector<1x4x13xf32>
    %53 = vector.shape_cast %52 : vector<1x4x13xf32> to vector<4x13xf32>
    %54 = vector.shape_cast %51 : vector<4x13xf32> to vector<1x4x13xf32>
    tpu.vector_store %arg3[%c0_28, %c0_29, %c52], %54 {strides = array<i32>} : memref<1x4x91xf32, #tpu.memory_space<vmem>>, vector<1x4x13xf32>,
    %c0_30 = arith.constant 0 : index
    %c0_31 = arith.constant 0 : index
    %c10 = arith.constant 10 : index
    %c0_32 = arith.constant 0 : index
    %55 = vector.load %arg2[%c0_30, %c0_31, %c10, %c0_32] : memref<1x4x16x16xf32, #tpu.memory_space<vmem>>, vector<1x4x3x16xf32>
    %56 = vector.shape_cast %55 : vector<1x4x3x16xf32> to vector<4x3x16xf32>
    %cst_33 = arith.constant dense<0xFF800000> : vector<4x16xf32>
    %57 = vector.multi_reduction <maximumf>, %56, %cst_33 [1] : vector<4x3x16xf32> to vector<4x16xf32>
    %58 = vector.extract_strided_slice %57 {offsets = [0, 0], sizes = [4, 13], strides = [1, 1]} : vector<4x16xf32> to vector<4x13xf32>
    %59 = vector.extract_strided_slice %57 {offsets = [0, 1], sizes = [4, 13], strides = [1, 1]} : vector<4x16xf32> to vector<4x13xf32>
    %60 = arith.maximumf %58, %59 : vector<4x13xf32>
    %61 = vector.extract_strided_slice %57 {offsets = [0, 2], sizes = [4, 13], strides = [1, 1]} : vector<4x16xf32> to vector<4x13xf32>
    %62 = arith.maximumf %60, %61 : vector<4x13xf32>
    %c0_34 = arith.constant 0 : index
    %c0_35 = arith.constant 0 : index
    %c65 = arith.constant 65 : index
    %63 = vector.load %arg3[%c0_34, %c0_35, %c65] : memref<1x4x91xf32, #tpu.memory_space<vmem>>, vector<1x4x13xf32>
    %64 = vector.shape_cast %63 : vector<1x4x13xf32> to vector<4x13xf32>
    %65 = vector.shape_cast %62 : vector<4x13xf32> to vector<1x4x13xf32>
    tpu.vector_store %arg3[%c0_34, %c0_35, %c65], %65 {strides = array<i32>} : memref<1x4x91xf32, #tpu.memory_space<vmem>>, vector<1x4x13xf32>,
    %c0_36 = arith.constant 0 : index
    %c0_37 = arith.constant 0 : index
    %c12 = arith.constant 12 : index
    %c0_38 = arith.constant 0 : index
    %66 = vector.load %arg2[%c0_36, %c0_37, %c12, %c0_38] : memref<1x4x16x16xf32, #tpu.memory_space<vmem>>, vector<1x4x3x16xf32>
    %67 = vector.shape_cast %66 : vector<1x4x3x16xf32> to vector<4x3x16xf32>
    %cst_39 = arith.constant dense<0xFF800000> : vector<4x16xf32>
    %68 = vector.multi_reduction <maximumf>, %67, %cst_39 [1] : vector<4x3x16xf32> to vector<4x16xf32>
    %69 = vector.extract_strided_slice %68 {offsets = [0, 0], sizes = [4, 13], strides = [1, 1]} : vector<4x16xf32> to vector<4x13xf32>
    %70 = vector.extract_strided_slice %68 {offsets = [0, 1], sizes = [4, 13], strides = [1, 1]} : vector<4x16xf32> to vector<4x13xf32>
    %71 = arith.maximumf %69, %70 : vector<4x13xf32>
    %72 = vector.extract_strided_slice %68 {offsets = [0, 2], sizes = [4, 13], strides = [1, 1]} : vector<4x16xf32> to vector<4x13xf32>
    %73 = arith.maximumf %71, %72 : vector<4x13xf32>
    %c0_40 = arith.constant 0 : index
    %c0_41 = arith.constant 0 : index
    %c78 = arith.constant 78 : index
    %74 = vector.load %arg3[%c0_40, %c0_41, %c78] : memref<1x4x91xf32, #tpu.memory_space<vmem>>, vector<1x4x13xf32>
    %75 = vector.shape_cast %74 : vector<1x4x13xf32> to vector<4x13xf32>
    %76 = vector.shape_cast %73 : vector<4x13xf32> to vector<1x4x13xf32>
    tpu.vector_store %arg3[%c0_40, %c0_41, %c78], %76 {strides = array<i32>} : memref<1x4x91xf32, #tpu.memory_space<vmem>>, vector<1x4x13xf32>,
    return
  }
  func.func @transform_0(%arg0: i32, %arg1: i32) -> (i32, i32, i32, i32) {
    %c0_i32 = arith.constant 0 : i32
    %c0_i32_0 = arith.constant 0 : i32
    %c0_i32_1 = arith.constant 0 : i32
    return %arg0, %arg1, %c0_i32, %c0_i32_0 : i32, i32, i32, i32
  }
  func.func @transform_1(%arg0: i32, %arg1: i32) -> (i32, i32, i32) {
    %c0_i32 = arith.constant 0 : i32
    %c0_i32_0 = arith.constant 0 : i32
    return %arg0, %arg1, %c0_i32 : i32, i32, i32
  }
}

</mosaic_0001>

<bundles_post_ra>
// kernel: tpu_custom_call.1
= control target key start
LH: loop header
LB: loop body
LE: loop exit
PB: predicated region body
PF: predicated region fallthrough
CT: control target
= control target key end

     0   :  { %6 = vsyncpa [#allocation3], 0  ;;  %s1513_s0 = inlined_call_operand.hbm [shape: f32[2,4,16,16], index: 0, kind: input, shape index: {}]   ;;  %s1514_s1 = inlined_call_operand.hbm [shape: f32[2,4,91], index: 1, kind: output, shape index: {}]  }
   0x1   :  { %8 = vsyncpa [#allocation3 + $0x1], 0 }
   0x2   :  { %9 = vsyncpa [#allocation4], 0 }
   0x3   :  { %11 = vsyncpa [#allocation4 + $0x1], 0  ;;  %s1058_s6 = smov 0   ;;  %s1060_s7 = smov 0  }
   0x4   :  { %s1062_s8 = smov 0   ;;  %s1064_s9 = smov 0  }
   0x5   :  { %s1066_s10 = smov 0   ;;  %s1068_s11 = smov 0  }
   0x6 LB: > { %s835_s12 = sadd.s32 4294967295, %s1034_s11   ;;  %s836_s13 = sadd.s32 4294967294, %s1034_s11   ;;  %s1034_s11 = sphi %s1068_s11, %s17_s11   ;;  %s1030_s10 = sphi %s1066_s10, %s1529_s10   ;;  %s1026_s9 = sphi %s1064_s9, %s1528_s9   ;;  %s1022_s8 = sphi %s1062_s8, %s1527_s8   ;;  %s1018_s7 = sphi %s1060_s7, %s1526_s7   ;;  %s1014_s6 = sphi %s1058_s6, %s1525_s6  }
   0x7   : > { %s29_s14 = sadd.s32 1, %s1030_s10  ;;  %s38_s15 = sadd.s32 1, %s1022_s8 }
   0x8   : > { %p31_p0 = scmp.ge.s32.totalorder %s29_s14, 2  ;;  %p45_p1 = scmp.ne.s32.totalorder %s1022_s8, %s1018_s7 }
   0x9   : > { %p46_p2 = scmp.eq.s32.totalorder %s1034_s11, 0  ;;  %p51_p3 = scmp.ne.s32.totalorder %s1018_s7, %s1014_s6 }
   0xa   : > { %s1531_s14 = smov (%p31_p0, %s29_s14), 0  ;;  %p52_p5 = scmp.eq.s32.totalorder %s835_s12, 0 }
   0xb   : > { %p1099_p4 = por %p46_p2, %p45_p1  ;;  %s33_s17 = ssub.s32 %s1030_s10, %s1531_s14 }
   0xc   : > { %p77_p6 = scmp.eq.s32.totalorder %s835_s12, 1  ;;  %p36_p7 = scmp.eq.s32.totalorder %s33_s17, 0 }
   0xd   : > { %p1105_p8 = por %p52_p5, %p51_p3  ;;  %p83_p10 = scmp.eq.s32.totalorder %s836_s13, 1 }
   0xe   : > { %p1109_p9 = por %p77_p6, %p45_p1  ;;  %p862_p13 = scmp.lt.s32.totalorder %s1034_s11, 2 }
   0xf   : > { %s1114_s20 = scalar_select %p36_p7, %s1022_s8, %s38_s15  }
  0x10   : > { %s1518_s19 = scalar_select %p1109_p9, 1, 0 }
  0x11   : > { %p1116_p11 = por %p83_p10, %p51_p3  ;;  %s103_s22 = sand.u32 1, %s1022_s8  }
  0x12   : > { %s839_s23 = sshll.u32 %s103_s22, 6  ;;  %s849_s24 = sshll.u32 %s1030_s10, 10 }
  0x13   : > { %s1519_s21 = scalar_select %p1116_p11, 1, 0 }
  0x14   : > { %s1127_s27 = scalar_lea.hbm %s1513_s0, %s849_s24  ;;  %s107_s28 = scalar_lea.vmem [#allocation2], %s839_s23 }
  0x15   : > { %s117_s29 = sshll.u32 %s107_s28, 4  ;;  %p1133_p0 = pnand %p862_p13, %p1099_p4  ;;  %s1129_s29 = int_to_ptr.vmem [resolvable:$true] %s117_s29 }
  0x16   : > { %s1138_s2 = scalar_lea.sflag [#allocation3], %s103_s22  ;;  %s922_s3 = scalar_lea.hbm %s1127_s27, 1024 }
  0x17   : > { %p923_p2 = scmp.ne.s32.totalorder %s1127_s27, %s922_s3  ;;  %p924_p3 = pneg %p1133_p0 }
  0x18   : > { %s927_s12 = scalar_lea.hbm %s1513_s0, 2048  ;;  %p928_p4 = scmp.lt.u32.totalorder %s1127_s27, %s1513_s0 }
  0x19   : > { %p925_p5 = pnand %p924_p3, %p923_p2  ;;  %p929_p7 = scmp.lt.u32.totalorder %s927_s12, %s922_s3 }
  0x1a   : > { %p931_p13 = scmp.lt.u32.totalorder %s922_s3, %s1127_s27 }
  0x1b   : > { %p926_p6 = pneg %p925_p5  ;;  %p930_p10 = por %p929_p7, %p928_p4 }
  0x1d   : > { %p932_p12 = por %p931_p13, %p930_p10 }
  0x1f   : > { %p933_p1 = pnand %p932_p12, %p926_p6 }
  0x21   : > { %936 = shalt.err (!%p933_p1)
}
  0x22   : > { %s937_s16 = scalar_lea.vmem %s1129_s29, 1024  ;;  %s1036_s17 = smov [#allocation2]  }
  0x23   : > { %p938_p2 = scmp.ne.s32.totalorder %s1129_s29, %s937_s16  ;;  %s942_s22 = sshll.u32 %s1036_s17, 4  ;;  %s943_s22 = int_to_ptr.vmem [resolvable:$false] %s942_s22 }
  0x24   : > { %s944_s23 = scalar_lea.vmem %s943_s22, 2048  ;;  %p945_p9 = scmp.lt.s32.totalorder %s1129_s29, %s943_s22 }
  0x25   : > { %p940_p5 = pnand %p938_p2, %p924_p3  ;;  %p946_p4 = scmp.lt.s32.totalorder %s944_s23, %s937_s16 }
  0x27   : > { %p941_p11 = pneg %p940_p5  ;;  %p947_p7 = por %p946_p4, %p945_p9 }
  0x29   : > { %p948_p10 = pnand %p947_p7, %p941_p11 }
  0x2b   : > { %951 = shalt.err (!%p948_p10)
}
  0x2c   : > { %s1037_s24 = smov 128   ;;  %s1038_s25 = smov 8  }
  0x2d   : > { %857 = dma.hbm_to_vmem [thread:$0]  (!%p1133_p0), %s1127_s27, 1024, %s1129_s29, %s1138_s2, %s1037_s24, %s1037_s24, %s1038_s25  }
  0x2e   : > { %p125_p12 = scmp.lt.s32.totalorder %s1034_s11, 3  ;;  %p1521_p1 = scmp.ge.s32.totalorder %s1034_s11, 1 }
  0x30   : > { %p126_p3 = pnand %p1521_p1, %p125_p12 }
  0x31   : > { %s1170_s26 = sand.u32 (!%p126_p3), 1, %s1018_s7  }
  0x32   : > { %129 = sbr.rel (%p126_p3) target bundleno = 414 (0x19e), region = 24  ;;  %s843_s28 = sshll.u32 (!%p126_p3), %s1170_s26, 6 }
  0x33   : > { %s132_s3 = scalar_lea.sflag (!%p126_p3), [#allocation3], %s1170_s26  ;;  %s1174_s4 = scalar_lea.vmem (!%p126_p3), [#allocation2], %s843_s28 }
  0x39   : > { %1005 = dma.done.wait (%p1105_p8), %s132_s3, 1024  }
  0x3a   : > { %1007 = vsyncadd (%p1105_p8), %s132_s3, 4294966272  ;;  %vm159_vm0 = vcmask 124928   ;;  %v324_v0 = vld [vmem:[%s1174_s4 + $0x14] sm:$0x7]  ;;  %v242_v2 = vld [vmem:[%s1174_s4 + $0x22] sm:$0x7] }
  0x3b   : > { %v241_v1 = vld [vmem:[%s1174_s4 + $0x12] sm:$0x7]  ;;  %v334_v3 = vsel %vm159_vm0, %v324_v0, -inf  ;;  %v258_v5 = vsel %vm159_vm0, %v242_v2, -inf  ;;  %v240_v6 = vld [vmem:[%s1174_s4 + $0x2] sm:$0x7] }
  0x3c   : > { %v251_v4 = vsel %vm159_vm0, %v241_v1, -inf  ;;  %v335_v7 = vrot.slane %v334_v3, 4  ;;  %v259_v9 = vrot.slane %v258_v5, 4  ;;  %v244_v10 = vsel %vm159_vm0, %v240_v6, -inf  ;;  %v243_v11 = vld [vmem:[%s1174_s4 + $0x32] sm:$0x7] }
  0x3d   : > { %v252_v8 = vrot.slane %v251_v4, 4  ;;  %v245_v12 = vrot.slane %v244_v10, 4  ;;  %v265_v13 = vsel %vm159_vm0, %v243_v11, -inf  ;;  %v325_v14 = vld [vmem:[%s1174_s4 + $0x24] sm:$0x7]  ;;  %s1039_s18 = smov 127  }
  0x3e   : > { %v407_v15 = vld [vmem:[%s1174_s4 + $0x16] sm:$0x7]  ;;  %v336_v16 = vmax.f32 %v334_v3, %v335_v7  ;;  %v260_v18 = vmax.f32 %v258_v5, %v259_v9  ;;  %v266_v19 = vrot.slane %v265_v13, 4  ;;  %v323_v20 = vld [vmem:[%s1174_s4 + $0x4] sm:$0x7]  ;;  %v341_v22 = vsel %vm159_vm0, %v325_v14, -inf }
  0x3f   : > { %v253_v17 = vmax.f32 %v251_v4, %v252_v8  ;;  %v246_v21 = vmax.f32 %v244_v10, %v245_v12  ;;  %v417_v23 = vsel %vm159_vm0, %v407_v15, -inf  ;;  %v327_v24 = vsel %vm159_vm0, %v323_v20, -inf  ;;  %v326_v41 = vld [vmem:[%s1174_s4 + $0x34] sm:$0x7]  ;;  %v408_v46 = vld [vmem:[%s1174_s4 + $0x26] sm:$0x7] }
  0x40   : > { %v337_v25 = vrot.slane %v336_v16, 2  ;;  %v261_v27 = vrot.slane %v260_v18, 2  ;;  %v267_v28 = vmax.f32 %v265_v13, %v266_v19  ;;  %v342_v30 = vrot.slane %v341_v22, 4  ;;  %v490_v50 = vld [vmem:[%s1174_s4 + $0x18] sm:$0x7]  ;;  %s1040_s27 = smov 126  }
  0x41   : > { %v254_v26 = vrot.slane %v253_v17, 2  ;;  %v247_v29 = vrot.slane %v246_v21, 2  ;;  %v418_v31 = vrot.slane %v417_v23, 4  ;;  %v328_v32 = vrot.slane %v327_v24, 4  ;;  %v406_v1 = vld [vmem:[%s1174_s4 + $0x6] sm:$0x7] }
  0x42   : > { %v338_v33 = vmax.f32 %v336_v16, %v337_v25  ;;  %v262_v35 = vmax.f32 %v260_v18, %v261_v27  ;;  %v268_v36 = vrot.slane %v267_v28, 2  ;;  %v343_v38 = vmax.f32 %v341_v22, %v342_v30  ;;  %v409_v9 = vld [vmem:[%s1174_s4 + $0x36] sm:$0x7]  ;;  %v491_v16 = vld [vmem:[%s1174_s4 + $0x28] sm:$0x7]  ;;  %s1041_s29 = smov 13  }
  0x43   : > { %v255_v34 = vmax.f32 %v253_v17, %v254_v26  ;;  %v248_v37 = vmax.f32 %v246_v21, %v247_v29  ;;  %v419_v39 = vmax.f32 %v417_v23, %v418_v31  ;;  %v329_v40 = vmax.f32 %v327_v24, %v328_v32  ;;  %v573_v21 = vld [vmem:[%s1174_s4 + $0x1a] sm:$0x7]  ;;  %s1042_s30 = smov 26   ;;  %s1043_s2 = smov 39  }
  0x44   : > { %v339_v42 = vrot.slane %v338_v33, 1  ;;  %v263_v44 = vrot.slane %v262_v35, 1  ;;  %v269_v45 = vmax.f32 %v267_v28, %v268_v36  ;;  %v344_v48 = vrot.slane %v343_v38, 2  ;;  %s1044_s5 = smov 52   ;;  %s1045_s12 = smov 65  }
  0x45   : > { %v256_v43 = vrot.slane %v255_v34, 1  ;;  %v249_v47 = vrot.slane %v248_v37, 1  ;;  %v420_v49 = vrot.slane %v419_v39, 2  ;;  %v330_v53 = vrot.slane %v329_v40, 2  ;;  %s1046_s13 = smov 78   ;;  %s844_s15 = sshll.u32 %s1170_s26, 2 }
  0x46   : > { %v1199_v51 = vmax.f32 %v338_v33, %v339_v42  ;;  %v1203_v54 = vmax.f32 %v262_v35, %v263_v44  ;;  %v270_v55 = vrot.slane %v269_v45, 1  ;;  %v345_v56 = vmax.f32 %v343_v38, %v344_v48  ;;  %s153_s16 = scalar_lea.vmem [#allocation5], %s844_s15  ;;  %s846_s17 = sshll.u32 %s1026_s9, 6 }
  0x47   : > { %v1201_v52 = vmax.f32 %v255_v34, %v256_v43  ;;  %v421_v57 = vmax.f32 %v419_v39, %v420_v49  ;;  %v1209_v58 = vmax.f32 %v248_v37, %v249_v47  ;;  %v348_v59 = vsel %vm159_vm0, %v326_v41, -inf  ;;  %v489_v37 = vld [vmem:[%s1174_s4 + $0x8] sm:$0x7]  ;;  %s753_s22 = sshll.u32 %s153_s16, 4  ;;  %s1464_s25 = scalar_lea.hbm %s1514_s1, %s846_s17  ;;  %s1466_s22 = int_to_ptr.vmem [resolvable:$true] %s753_s22 }
  0x48   : > { %361 = vrot.lane.b32.xlu1 %v1199_v51, %s1039_s18  ;;  %v424_v60 = vsel %vm159_vm0, %v408_v46, -inf  ;;  %v500_v61 = vsel %vm159_vm0, %v490_v50, -inf  ;;  %v349_v62 = vrot.slane %v348_v59, 4  ;;  %v346_v2 = vrot.slane %v345_v56, 1  ;;  %s739_s28 = scalar_lea.sflag [#allocation4], %s1170_s26  ;;  %s952_s3 = scalar_lea.vmem %s1466_s22, 64 }
  0x49   : > { %278 = vrot.lane.b32.xlu0 %v1201_v52, %s1039_s18  ;;  %v425_v63 = vrot.slane %v424_v60, 4  ;;  %v501_v0 = vrot.slane %v500_v61, 4  ;;  %v422_v3 = vrot.slane %v421_v57, 1  ;;  %v331_v4 = vmax.f32 %v329_v40, %v330_v53  ;;  %p953_p8 = scmp.ne.s32.totalorder %s1466_s22, %s952_s3  ;;  %p1522_p9 = scmp.ne.s32.totalorder %s1518_s19, 0 }
  0x4a   : > { %v350_v5 = vmax.f32 %v348_v59, %v349_v62  ;;  %v1219_v6 = vmax.f32 %v269_v45, %v270_v55  ;;  %v410_v11 = vsel %vm159_vm0, %v406_v1, -inf  ;;  %v1223_v12 = vmax.f32 %v345_v56, %v346_v2  ;;  %v492_v45 = vld [vmem:[%s1174_s4 + $0x38] sm:$0x7]  ;;  %v574_v55 = vld [vmem:[%s1174_s4 + $0x2a] sm:$0x7]  ;;  %s1047_s9 = smov [#allocation5]  }
  0x4b   : > { %v426_v7 = vmax.f32 %v424_v60, %v425_v63  ;;  %v502_v8 = vmax.f32 %v500_v61, %v501_v0  ;;  %v1225_v13 = vmax.f32 %v421_v57, %v422_v3  ;;  %v332_v14 = vrot.slane %v331_v4, 1  ;;  %v656_v56 = vld [vmem:[%s1174_s4 + $0x1c] sm:$0x7]  ;;  %p954_p11 = pnand %p953_p8, %p1522_p9 }
  0x4c   : > { %276 = vrot.lane.b32.xlu1 %v1209_v58, %s1039_s18  ;;  %v351_v10 = vrot.slane %v350_v5, 2  ;;  %v431_v15 = vsel %vm159_vm0, %v409_v9, -inf  ;;  %v411_v20 = vrot.slane %v410_v11, 4  ;;  %v507_v24 = vsel %vm159_vm0, %v491_v16, -inf }
  0x4d   : > { %280 = vrot.lane.b32.xlu0 %v1203_v54, %s1039_s18  ;;  %v427_v18 = vrot.slane %v426_v7, 2  ;;  %v503_v19 = vrot.slane %v502_v8, 2  ;;  %v1234_v22 = vmax.f32 %v331_v4, %v332_v14  ;;  %v432_v23 = vrot.slane %v431_v15, 4  ;;  %p955_p0 = pneg %p954_p11 }
  0x4e   : > { %v352_v17 = vmax.f32 %v350_v5, %v351_v10  ;;  %v583_v25 = vsel %vm159_vm0, %v573_v21, -inf  ;;  %v412_v29 = vmax.f32 %v410_v11, %v411_v20  ;;  %v508_v31 = vrot.slane %v507_v24, 4  ;;  %v572_v10 = vld [vmem:[%s1174_s4 + $0xa] sm:$0x7] }
  0x4f   : > { %v428_v27 = vmax.f32 %v426_v7, %v427_v18  ;;  %v504_v28 = vmax.f32 %v502_v8, %v503_v19  ;;  %v433_v30 = vmax.f32 %v431_v15, %v432_v23  ;;  %v584_v32 = vrot.slane %v583_v25, 4  ;;  %v575_v19 = vld [vmem:[%s1174_s4 + $0x3a] sm:$0x7] }
  0x50   : > { %294 = vrot.lane.b32.xlu1 %v1201_v52, %s1040_s27  ;;  %v353_v26 = vrot.slane %v352_v17, 1  ;;  %v413_v36 = vrot.slane %v412_v29, 2  ;;  %v509_v39 = vmax.f32 %v507_v24, %v508_v31  ;;  %v493_v44 = vsel %vm159_vm0, %v489_v37, -inf }
  0x51   : > { %282 = vrot.lane.b32.xlu0 %v1219_v6, %s1039_s18  ;;  %v429_v34 = vrot.slane %v428_v27, 1  ;;  %v505_v35 = vrot.slane %v504_v28, 1  ;;  %v434_v38 = vrot.slane %v433_v30, 2  ;;  %v585_v40 = vmax.f32 %v583_v25, %v584_v32 }
  0x52   : > { %v1246_v33 = vmax.f32 %v352_v17, %v353_v26  ;;  %v414_v43 = vmax.f32 %v412_v29, %v413_v36  ;;  %v510_v47 = vrot.slane %v509_v39, 2  ;;  %v494_v48 = vrot.slane %v493_v44, 4 }
  0x53   : > { %v1253_v41 = vmax.f32 %v428_v27, %v429_v34  ;;  %v1255_v42 = vmax.f32 %v504_v28, %v505_v35  ;;  %v435_v46 = vmax.f32 %v433_v30, %v434_v38  ;;  %v586_v50 = vrot.slane %v585_v40, 2  ;;  %v657_v28 = vld [vmem:[%s1174_s4 + $0x2c] sm:$0x7] }
  0x54   : > { %444 = vrot.lane.b32.xlu1 %v1225_v13, %s1039_s18  ;;  %v415_v49 = vrot.slane %v414_v43, 1  ;;  %v514_v53 = vsel %vm159_vm0, %v492_v45, -inf  ;;  %v511_v59 = vmax.f32 %v509_v39, %v510_v47  ;;  %v495_v60 = vmax.f32 %v493_v44, %v494_v48  ;;  %v655_v45 = vld [vmem:[%s1174_s4 + $0xc] sm:$0x7] }
  0x55   : > { %363 = vrot.lane.b32.xlu0 %v1223_v12, %s1039_s18  ;;  %v436_v57 = vrot.slane %v435_v46, 1  ;;  %v587_v62 = vmax.f32 %v585_v40, %v586_v50  ;;  %v515_v63 = vrot.slane %v514_v53, 4  ;;  %v590_v0 = vsel %vm159_vm0, %v574_v55, -inf }
  0x56   : > { %v1270_v61 = vmax.f32 %v414_v43, %v415_v49  ;;  %v666_v1 = vsel %vm159_vm0, %v656_v56, -inf  ;;  %v512_v3 = vrot.slane %v511_v59, 1  ;;  %v496_v4 = vrot.slane %v495_v60, 2 }
  0x57   : > { %v1274_v2 = vmax.f32 %v435_v46, %v436_v57  ;;  %v588_v5 = vrot.slane %v587_v62, 1  ;;  %v516_v7 = vmax.f32 %v514_v53, %v515_v63  ;;  %v591_v8 = vrot.slane %v590_v0, 4  ;;  %v658_v46 = vld [vmem:[%s1174_s4 + $0x3c] sm:$0x7] }
  0x58   : > { %359 = vrot.lane.b32.xlu1 %v1234_v22, %s1039_s18  ;;  %v667_v9 = vrot.slane %v666_v1, 4  ;;  %v1281_v11 = vmax.f32 %v511_v59, %v512_v3  ;;  %v497_v14 = vmax.f32 %v495_v60, %v496_v4  ;;  %v576_v20 = vsel %vm159_vm0, %v572_v10, -inf }
  0x59   : > { %296 = vrot.lane.b32.xlu0 %v1203_v54, %s1040_s27  ;;  %v1287_v15 = vmax.f32 %v587_v62, %v588_v5  ;;  %v517_v16 = vrot.slane %v516_v7, 2  ;;  %v592_v17 = vmax.f32 %v590_v0, %v591_v8  ;;  %v597_v23 = vsel %vm159_vm0, %v575_v19, -inf }
  0x5a   : > { %v668_v18 = vmax.f32 %v666_v1, %v667_v9  ;;  %v498_v21 = vrot.slane %v497_v14, 1  ;;  %v577_v27 = vrot.slane %v576_v20, 4  ;;  %v598_v30 = vrot.slane %v597_v23, 4 }
  0x5b   : > { %v518_v24 = vmax.f32 %v516_v7, %v517_v16  ;;  %v593_v25 = vrot.slane %v592_v17, 2  ;;  %v673_v31 = vsel %vm159_vm0, %v657_v28, -inf  ;;  %v659_v48 = vsel %vm159_vm0, %v655_v45, -inf  ;;  %v156_v16 = vld [vmem:[%s1174_s4 + $0x10] sm:$0x7] }
  0x5c   : > { %377 = vrot.lane.b32.xlu1 %v1199_v51, %s1040_s27  ;;  %v669_v26 = vrot.slane %v668_v18, 2  ;;  %v1297_v29 = vmax.f32 %v497_v14, %v498_v21  ;;  %v578_v36 = vmax.f32 %v576_v20, %v577_v27  ;;  %v599_v37 = vmax.f32 %v597_v23, %v598_v30  ;;  %v157_v14 = vld [vmem:[%s1174_s4 + $0x20] sm:$0x7]  ;;  %v158_v23 = vld [vmem:[%s1174_s4 + $0x30] sm:$0x7] }
  0x5d   : > { %365 = vrot.lane.b32.xlu0 %v1246_v33, %s1039_s18  ;;  %v519_v32 = vrot.slane %v518_v24, 1  ;;  %v594_v34 = vmax.f32 %v592_v17, %v593_v25  ;;  %v674_v38 = vrot.slane %v673_v31, 4  ;;  %v680_v56 = vsel %vm159_vm0, %v658_v46, -inf }
  0x5e   : > { %v670_v35 = vmax.f32 %v668_v18, %v669_v26  ;;  %v579_v44 = vrot.slane %v578_v36, 2  ;;  %v600_v55 = vrot.slane %v599_v37, 2  ;;  %v660_v57 = vrot.slane %v659_v48, 4 }
  0x5f   : > { %v1308_v39 = vmax.f32 %v518_v24, %v519_v32  ;;  %v595_v40 = vrot.slane %v594_v34, 1  ;;  %v675_v47 = vmax.f32 %v673_v31, %v674_v38  ;;  %v681_v63 = vrot.slane %v680_v56, 4  ;;  %v155_v24 = vld [vmem:[%s1174_s4] sm:$0x7]  ;;  %s956_s4 = sshll.u32 %s1047_s9, 4  ;;  %s957_s4 = int_to_ptr.vmem [resolvable:$false] %s956_s4 }
  0x60   : > { %527 = vrot.lane.b32.xlu1 %v1255_v42, %s1039_s18  ;;  %v671_v43 = vrot.slane %v670_v35, 1  ;;  %v580_v53 = vmax.f32 %v578_v36, %v579_v44  ;;  %v601_v60 = vmax.f32 %v599_v37, %v600_v55  ;;  %v661_v0 = vmax.f32 %v659_v48, %v660_v57  ;;  %p959_p6 = scmp.lt.s32.totalorder %s1466_s22, %s957_s4 }
  0x61   : > { %446 = vrot.lane.b32.xlu0 %v1253_v41, %s1039_s18  ;;  %v1317_v49 = vmax.f32 %v594_v34, %v595_v40  ;;  %v676_v62 = vrot.slane %v675_v47, 2  ;;  %v682_v5 = vmax.f32 %v680_v56, %v681_v63  ;;  %v174_v20 = vsel %vm159_vm0, %v157_v14, -inf }
  0x62   : > { %v1319_v50 = vmax.f32 %v670_v35, %v671_v43  ;;  %v581_v59 = vrot.slane %v580_v53, 1  ;;  %v602_v3 = vrot.slane %v601_v60, 1  ;;  %v662_v7 = vrot.slane %v661_v0, 2 }
  0x63   : > { %v677_v4 = vmax.f32 %v675_v47, %v676_v62  ;;  %v683_v10 = vrot.slane %v682_v5, 2  ;;  %v167_v21 = vsel %vm159_vm0, %v156_v16, -inf  ;;  %v175_v26 = vrot.slane %v174_v20, 4 }
  0x64   : > { %298 = vrot.lane.b32.xlu1 %v1219_v6, %s1040_s27  ;;  %v1330_v1 = vmax.f32 %v580_v53, %v581_v59  ;;  %v1336_v8 = vmax.f32 %v601_v60, %v602_v3  ;;  %v663_v17 = vmax.f32 %v661_v0, %v662_v7  ;;  %v168_v28 = vrot.slane %v167_v21, 4 }
  0x65   : > { %292 = vrot.lane.b32.xlu0 %v1209_v58, %s1040_s27  ;;  %v678_v9 = vrot.slane %v677_v4, 1  ;;  %v684_v19 = vmax.f32 %v682_v5, %v683_v10  ;;  %v181_v30 = vsel %vm159_vm0, %v158_v23, -inf  ;;  %v160_v31 = vsel %vm159_vm0, %v155_v24, -inf }
  0x66   : > { %v664_v25 = vrot.slane %v663_v17, 1  ;;  %v176_v34 = vmax.f32 %v174_v20, %v175_v26  ;;  %v169_v36 = vmax.f32 %v167_v21, %v168_v28  ;;  %v182_v37 = vrot.slane %v181_v30, 4 }
  0x67   : > { %v1344_v18 = vmax.f32 %v677_v4, %v678_v9  ;;  %v685_v27 = vrot.slane %v684_v19, 1  ;;  %v161_v38 = vrot.slane %v160_v31, 4  ;;  %vm229_vm1 = vcmask 1041409  }
  0x68   : > { %442 = vrot.lane.b32.xlu1 %v1270_v61, %s1039_s18  ;;  %v1356_v32 = vmax.f32 %v663_v17, %v664_v25  ;;  %v177_v40 = vrot.slane %v176_v34, 2  ;;  %v170_v43 = vrot.slane %v169_v36, 2  ;;  %v183_v44 = vmax.f32 %v181_v30, %v182_v37 }
  0x69   : > { %379 = vrot.lane.b32.xlu0 %v1223_v12, %s1040_s27  ;;  %v1362_v35 = vmax.f32 %v684_v19, %v685_v27  ;;  %v162_v45 = vmax.f32 %v160_v31, %v161_v38  ;;  %vm232_vm2 = vcmask 1042434   ;;  %vm235_vm3 = vcmask 1043459  }
  0x6a   : > { %v178_v46 = vmax.f32 %v176_v34, %v177_v40  ;;  %v171_v47 = vmax.f32 %v169_v36, %v170_v43  ;;  %v184_v48 = vrot.slane %v183_v44, 2  ;;  %vm238_vm4 = vcmask 101376  }
  0x6b   : > { %v163_v53 = vrot.slane %v162_v45, 2  ;;  %vm321_vm5 = vcmask 207976   ;;  %vm404_vm6 = vcmask 314576   ;;  %vm487_vm7 = vcmask 421176  }
  0x6c   : > { %460 = vrot.lane.b32.xlu1 %v1225_v13, %s1040_s27  ;;  %v179_v55 = vrot.slane %v178_v46, 1  ;;  %v172_v56 = vrot.slane %v171_v47, 1  ;;  %v185_v57 = vmax.f32 %v183_v44, %v184_v48  ;;  %vm570_vm8 = vcmask 527776  }
  0x6d   : > { %448 = vrot.lane.b32.xlu0 %v1274_v2, %s1039_s18  ;;  %v164_v59 = vmax.f32 %v162_v45, %v163_v53  ;;  %vm653_vm9 = vcmask 634376   ;;  %vm736_vm10 = vcmask 740976  }
  0x6e   : > { %v1380_v60 = vmax.f32 %v178_v46, %v179_v55  ;;  %v1382_v62 = vmax.f32 %v171_v47, %v172_v56  ;;  %v186_v63 = vrot.slane %v185_v57, 1 }
  0x6f   : > { %v165_v0 = vrot.slane %v164_v59, 1 }
  0x70   : > { %610 = vrot.lane.b32.xlu1 %v1287_v15, %s1039_s18  ;;  %v1388_v3 = vmax.f32 %v185_v57, %v186_v63 }
  0x71   : > { %529 = vrot.lane.b32.xlu0 %v1281_v11, %s1039_s18  ;;  %v1390_v4 = vmax.f32 %v164_v59, %v165_v0 }
  0x74   : > { %381 = vrot.lane.b32.xlu1 %v1246_v33, %s1040_s27 }
  0x75   : > { %375 = vrot.lane.b32.xlu0 %v1234_v22, %s1040_s27 }
  0x78   : > { %525 = vrot.lane.b32.xlu1 %v1297_v29, %s1039_s18 }
  0x79   : > { %462 = vrot.lane.b32.xlu0 %v1253_v41, %s1040_s27 }
  0x7c   : > { %543 = vrot.lane.b32.xlu1 %v1255_v42, %s1040_s27 }
  0x7d   : > { %531 = vrot.lane.b32.xlu0 %v1308_v39, %s1039_s18 }
  0x80   : > { %693 = vrot.lane.b32.xlu1 %v1319_v50, %s1039_s18 }
  0x81   : > { %612 = vrot.lane.b32.xlu0 %v1317_v49, %s1039_s18 }
  0x84   : > { %464 = vrot.lane.b32.xlu1 %v1274_v2, %s1040_s27 }
  0x85   : > { %458 = vrot.lane.b32.xlu0 %v1270_v61, %s1040_s27 }
  0x88   : > { %608 = vrot.lane.b32.xlu1 %v1330_v1, %s1039_s18 }
  0x89   : > { %545 = vrot.lane.b32.xlu0 %v1281_v11, %s1040_s27 }
  0x8c   : > { %626 = vrot.lane.b32.xlu1 %v1287_v15, %s1040_s27 }
  0x8d   : > { %614 = vrot.lane.b32.xlu0 %v1336_v8, %s1039_s18 }
  0x90   : > { %541 = vrot.lane.b32.xlu1 %v1297_v29, %s1040_s27 }
  0x91   : > { %695 = vrot.lane.b32.xlu0 %v1344_v18, %s1039_s18 }
  0x94   : > { %628 = vrot.lane.b32.xlu1 %v1317_v49, %s1040_s27 }
  0x95   : > { %547 = vrot.lane.b32.xlu0 %v1308_v39, %s1040_s27 }
  0x98   : > { %697 = vrot.lane.b32.xlu1 %v1362_v35, %s1039_s18 }
  0x99   : > { %691 = vrot.lane.b32.xlu0 %v1356_v32, %s1039_s18 }
  0x9c   : > { %624 = vrot.lane.b32.xlu1 %v1330_v1, %s1040_s27 }
  0x9d   : > { %709 = vrot.lane.b32.xlu0 %v1319_v50, %s1040_s27 }
  0xa0   : > { %711 = vrot.lane.b32.xlu1 %v1344_v18, %s1040_s27 }
  0xa1   : > { %630 = vrot.lane.b32.xlu0 %v1336_v8, %s1040_s27 }
  0xa4   : > { %713 = vrot.lane.b32.xlu1 %v1362_v35, %s1040_s27 }
  0xa5   : > { %707 = vrot.lane.b32.xlu0 %v1356_v32, %s1040_s27 }
  0xa8   : > { %196 = vrot.lane.b32.xlu1 %v1380_v60, %s1039_s18 }
  0xa9   : > { %194 = vrot.lane.b32.xlu0 %v1382_v62, %s1039_s18 }
  0xac   : > { %198 = vrot.lane.b32.xlu1 %v1388_v3, %s1039_s18 }
  0xad   : > { %192 = vrot.lane.b32.xlu0 %v1390_v4, %s1039_s18  ;;  %s958_s18 = scalar_lea.vmem %s957_s4, 128 }
  0xae   : > { %p960_p13 = scmp.lt.s32.totalorder %s958_s18, %s952_s3 }
  0xb0   : > { %212 = vrot.lane.b32.xlu1 %v1380_v60, %s1040_s27  ;;  %p961_p2 = por %p960_p13, %p959_p6 }
  0xb1   : > { %210 = vrot.lane.b32.xlu0 %v1382_v62, %s1040_s27 }
  0xb2   : > { %p962_p5 = pnand %p961_p2, %p955_p0 }
  0xb4   : > { %214 = vrot.lane.b32.xlu1 %v1388_v3, %s1040_s27 }
  0xb5   : > { %208 = vrot.lane.b32.xlu0 %v1390_v4, %s1040_s27 }
  0xba   : > { %v362_v5 = vpop.permute.xlu1 %361 }
  0xbb   : > { %v279_v7 = vpop.permute.xlu0 %278  ;;  %v372_v55 = vmax.f32 %v1199_v51, %v362_v5 }
  0xbc   : > { %v289_v25 = vmax.f32 %v1201_v52, %v279_v7 }
  0xbe   : > { %v277_v10 = vpop.permute.xlu1 %276 }
  0xbf   : > { %v281_v9 = vpop.permute.xlu0 %280  ;;  %v288_v34 = vmax.f32 %v1209_v58, %v277_v10 }
  0xc0   : > { %v290_v26 = vmax.f32 %v1203_v54, %v281_v9 }
  0xc2   : > { %v295_v16 = vpop.permute.xlu1 %294 }
  0xc3   : > { %v283_v14 = vpop.permute.xlu0 %282  ;;  %v305_v30 = vmax.f32 %v289_v25, %v295_v16 }
  0xc4   : > { %v291_v36 = vmax.f32 %v1219_v6, %v283_v14 }
  0xc5   : > { %v312_v40 = vrot.slane %v305_v30, 7 }
  0xc6   : > { %v445_v19 = vpop.permute.xlu1 %444 }
  0xc7   : > { %v364_v17 = vpop.permute.xlu0 %363 }
  0xc8   : > { %v373_v56 = vmax.f32 %v1223_v12, %v364_v17 }
  0xca   : > { %v360_v21 = vpop.permute.xlu1 %359 }
  0xcb   : > { %v297_v20 = vpop.permute.xlu0 %296  ;;  %v371_v7 = vmax.f32 %v1234_v22, %v360_v21 }
  0xcc   : > { %v306_v31 = vmax.f32 %v290_v26, %v297_v20 }
  0xce   : > { %v378_v24 = vpop.permute.xlu1 %377  ;;  %v314_v45 = vrot.slane %v306_v31, 6 }
  0xcf   : > { %v366_v23 = vpop.permute.xlu0 %365  ;;  %v388_v63 = vmax.f32 %v372_v55, %v378_v24 }
  0xd0   : > { %v374_v9 = vmax.f32 %v1246_v33, %v366_v23  ;;  %v455_v33 = vmax.f32 %v1225_v13, %v445_v19 }
  0xd1   : > { %v395_v16 = vrot.slane %v388_v63, 7 }
  0xd2   : > { %v1406_v28 = vpop.permute.xlu1 %527 }
  0xd3   : > { %v447_v27 = vpop.permute.xlu0 %446 }
  0xd4   : > { %v456_v23 = vmax.f32 %v1253_v41, %v447_v27 }
  0xd6   : > { %v299_v38 = vpop.permute.xlu1 %298 }
  0xd7   : > { %v293_v37 = vpop.permute.xlu0 %292  ;;  %v307_v44 = vmax.f32 %v291_v36, %v299_v38 }
  0xd8   : > { %v304_v43 = vmax.f32 %v288_v34, %v293_v37 }
  0xd9   : > { %v316_v54 = vrot.slane %v307_v44, 5 }
  0xda   : > { %v313_v52 = vsel %vm229_vm1, %v312_v40, %v304_v43  ;;  %v443_v47 = vpop.permute.xlu1 %442 }
  0xdb   : > { %v380_v46 = vpop.permute.xlu0 %379  ;;  %v315_v48 = vsel %vm232_vm2, %v314_v45, %v313_v52  ;;  %v454_v38 = vmax.f32 %v1270_v61, %v443_v47 }
  0xdc   : > { %v317_v58 = vsel %vm235_vm3, %v316_v54, %v315_v48  ;;  %v389_v0 = vmax.f32 %v373_v56, %v380_v46 }
  0xdd   : > { %318 = vrot.lane.b32.xlu0 %v317_v58, %s1041_s29 }
  0xde   : > { %v461_v53 = vpop.permute.xlu1 %460  ;;  %v397_v26 = vrot.slane %v389_v0, 6 }
  0xdf   : > { %v449_v6 = vpop.permute.xlu0 %448  ;;  %v471_v36 = vmax.f32 %v455_v33, %v461_v53 }
  0xe0   : > { %v457_v40 = vmax.f32 %v1274_v2, %v449_v6  ;;  %v538_v2 = vmax.f32 %v1255_v42, %v1406_v28 }
  0xe1   : > { %v478_v45 = vrot.slane %v471_v36, 7 }
  0xe2   : > { %v1415_v59 = vpop.permute.xlu1 %610 }
  0xe3   : > { %v530_v57 = vpop.permute.xlu0 %529 }
  0xe4   : > { %v539_v55 = vmax.f32 %v1281_v11, %v530_v57  ;;  %v621_v11 = vmax.f32 %v1287_v15, %v1415_v59 }
  0xe6   : > { %v382_v14 = vpop.permute.xlu1 %381 }
  0xe7   : > { %v376_v10 = vpop.permute.xlu0 %375  ;;  %v390_v25 = vmax.f32 %v374_v9, %v382_v14 }
  0xe8   : > { %v387_v20 = vmax.f32 %v371_v7, %v376_v10 }
  0xe9   : > { %v399_v51 = vrot.slane %v390_v25, 5 }
  0xea   : > { %v396_v30 = vsel %vm229_vm1, %v395_v16, %v387_v20  ;;  %v526_v12 = vpop.permute.xlu1 %525 }
  0xeb   : > { %v463_v5 = vpop.permute.xlu0 %462  ;;  %v398_v17 = vsel %vm232_vm2, %v397_v26, %v396_v30  ;;  %v537_v6 = vmax.f32 %v1297_v29, %v526_v12 }
  0xec   : > { %v400_v24 = vsel %vm235_vm3, %v399_v51, %v398_v17  ;;  %v472_v37 = vmax.f32 %v456_v23, %v463_v5 }
  0xed   : > { %401 = vrot.lane.b32.xlu1 %v400_v24, %s1042_s30 }
  0xee   : > { %v544_v21 = vpop.permute.xlu1 %543  ;;  %v480_v46 = vrot.slane %v472_v37, 6 }
  0xef   : > { %v532_v22 = vpop.permute.xlu0 %531  ;;  %v554_v53 = vmax.f32 %v538_v2, %v544_v21 }
  0xf0   : > { %v540_v9 = vmax.f32 %v1308_v39, %v532_v22 }
  0xf1   : > { %v561_v10 = vrot.slane %v554_v53, 7 }
  0xf2   : > { %v694_v34 = vpop.permute.xlu1 %693 }
  0xf3   : > { %v613_v31 = vpop.permute.xlu0 %612  ;;  %v704_v21 = vmax.f32 %v1319_v50, %v694_v34 }
  0xf4   : > { %v622_v5 = vmax.f32 %v1317_v49, %v613_v31 }
  0xf6   : > { %v465_v44 = vpop.permute.xlu1 %464 }
  0xf7   : > { %v459_v43 = vpop.permute.xlu0 %458  ;;  %v473_v54 = vmax.f32 %v457_v40, %v465_v44 }
  0xf8   : > { %v470_v52 = vmax.f32 %v454_v38, %v459_v43 }
  0xf9   : > { %v482_v58 = vrot.slane %v473_v54, 5 }
  0xfa   : > { %v479_v48 = vsel %vm229_vm1, %v478_v45, %v470_v52  ;;  %v609_v19 = vpop.permute.xlu1 %608 }
  0xfb   : > { %v546_v13 = vpop.permute.xlu0 %545  ;;  %v481_v41 = vsel %vm232_vm2, %v480_v46, %v479_v48  ;;  %v620_v39 = vmax.f32 %v1330_v1, %v609_v19 }
  0xfc   : > { %v483_v27 = vsel %vm235_vm3, %v482_v58, %v481_v41  ;;  %v555_v7 = vmax.f32 %v539_v55, %v546_v13 }
  0xfd   : > { %484 = vrot.lane.b32.xlu0 %v483_v27, %s1043_s2 }
  0xfe   : > { %v627_v47 = vpop.permute.xlu1 %626  ;;  %v563_v26 = vrot.slane %v555_v7, 6 }
  0xff   : > { %v615_v61 = vpop.permute.xlu0 %614  ;;  %v637_v51 = vmax.f32 %v621_v11, %v627_v47 }
 0x100   : > { %v623_v33 = vmax.f32 %v1336_v8, %v615_v61 }
 0x101   : > { %v644_v23 = vrot.slane %v637_v51, 7 }
 0x102   : > { %v542_v63 = vpop.permute.xlu1 %541 }
 0x103   : > { %v696_v56 = vpop.permute.xlu0 %695  ;;  %v553_v0 = vmax.f32 %v537_v6, %v542_v63 }
 0x104   : > { %v705_v15 = vmax.f32 %v1344_v18, %v696_v56 }
 0x105   : > { %v562_v20 = vsel %vm229_vm1, %v561_v10, %v553_v0 }
 0x106   : > { %v629_v16 = vpop.permute.xlu1 %628  ;;  %v564_v29 = vsel %vm232_vm2, %v563_v26, %v562_v20 }
 0x107   : > { %v548_v14 = vpop.permute.xlu0 %547  ;;  %v638_v22 = vmax.f32 %v622_v5, %v629_v16 }
 0x108   : > { %v556_v25 = vmax.f32 %v540_v9, %v548_v14 }
 0x109   : > { %v646_v40 = vrot.slane %v638_v22, 6 }
 0x10a   : > { %v565_v30 = vrot.slane %v556_v25, 5  ;;  %v698_v28 = vpop.permute.xlu1 %697 }
 0x10b   : > { %v692_v42 = vpop.permute.xlu0 %691  ;;  %v706_v31 = vmax.f32 %v1362_v35, %v698_v28 }
 0x10c   : > { %v566_v57 = vsel %vm235_vm3, %v565_v30, %v564_v29  ;;  %v703_v49 = vmax.f32 %v1356_v32, %v692_v42 }
 0x10d   : > { %567 = vrot.lane.b32.xlu1 %v566_v57, %s1044_s5 }
 0x10e   : > { %v625_v17 = vpop.permute.xlu1 %624 }
 0x10f   : > { %v710_v12 = vpop.permute.xlu0 %709  ;;  %v636_v24 = vmax.f32 %v620_v39, %v625_v17 }
 0x110   : > { %v720_v37 = vmax.f32 %v704_v21, %v710_v12 }
 0x111   : > { %v645_v38 = vsel %vm229_vm1, %v644_v23, %v636_v24 }
 0x112   : > { %v712_v36 = vpop.permute.xlu1 %711  ;;  %v647_v8 = vsel %vm232_vm2, %v646_v40, %v645_v38  ;;  %v727_v34 = vrot.slane %v720_v37, 7 }
 0x113   : > { %v631_v59 = vpop.permute.xlu0 %630  ;;  %v721_v43 = vmax.f32 %v705_v15, %v712_v36 }
 0x114   : > { %v639_v1 = vmax.f32 %v623_v33, %v631_v59 }
 0x115   : > { %v729_v46 = vrot.slane %v721_v43, 6 }
 0x116   : > { %v648_v44 = vrot.slane %v639_v1, 5  ;;  %v714_v50 = vpop.permute.xlu1 %713 }
 0x117   : > { %v708_v45 = vpop.permute.xlu0 %707  ;;  %v722_v18 = vmax.f32 %v706_v31, %v714_v50 }
 0x118   : > { %v719_v52 = vmax.f32 %v703_v49, %v708_v45  ;;  %v649_v54 = vsel %vm235_vm3, %v648_v44, %v647_v8 }
 0x119   : > { %650 = vrot.lane.b32.xlu0 %v649_v54, %s1045_s12  ;;  %v731_v58 = vrot.slane %v722_v18, 5 }
 0x11a   : > { %v728_v48 = vsel %vm229_vm1, %v727_v34, %v719_v52  ;;  %v197_v13 = vpop.permute.xlu1 %196 }
 0x11b   : > { %v730_v32 = vsel %vm232_vm2, %v729_v46, %v728_v48  ;;  %v195_v35 = vpop.permute.xlu0 %194  ;;  %v206_v61 = vmax.f32 %v1380_v60, %v197_v13 }
 0x11c   : > { %v732_v19 = vsel %vm235_vm3, %v731_v58, %v730_v32  ;;  %v205_v47 = vmax.f32 %v1382_v62, %v195_v35 }
 0x11d   : > { %733 = vrot.lane.b32.xlu1 %v732_v19, %s1046_s13 }
 0x11e   : > { %v199_v41 = vpop.permute.xlu1 %198 }
 0x11f   : > { %v193_v27 = vpop.permute.xlu0 %192  ;;  %v207_v53 = vmax.f32 %v1388_v3, %v199_v41 }
 0x120   : > { %v204_v55 = vmax.f32 %v1390_v4, %v193_v27 }
 0x122   : > { %v213_v2 = vpop.permute.xlu1 %212 }
 0x123   : > { %v211_v6 = vpop.permute.xlu0 %210  ;;  %v222_v56 = vmax.f32 %v206_v61, %v213_v2 }
 0x124   : > { %v221_v63 = vmax.f32 %v205_v47, %v211_v6 }
 0x125   : > { %v231_v7 = vrot.slane %v222_v56, 6 }
 0x126   : > { %v228_v0 = vrot.slane %v221_v63, 7  ;;  %v215_v9 = vpop.permute.xlu1 %214 }
 0x127   : > { %v209_v10 = vpop.permute.xlu0 %208  ;;  %v223_v14 = vmax.f32 %v207_v53, %v215_v9 }
 0x128   : > { %v220_v16 = vmax.f32 %v204_v55, %v209_v10 }
 0x129   : > { %v234_v20 = vrot.slane %v223_v14, 5 }
 0x12a   : > { %v230_v60 = vsel %vm229_vm1, %v228_v0, %v220_v16 }
 0x12b   : > { %v233_v62 = vsel %vm232_vm2, %v231_v7, %v230_v60 }
 0x12c   : > { %v236_v25 = vsel %vm235_vm3, %v234_v20, %v233_v62 }
 0x12d   : > { %239 = vst.msk [vmem:[%s153_s16] sm:$0xf] %vm238_vm4, %v236_v25 }
 0x14f   : > { %v319_v3 = vpop.permute.xlu0 %318 }
 0x150   : > { %322 = vst.msk [vmem:[%s153_s16] sm:$0xf] %vm321_vm5, %v319_v3 }
 0x15f   : > { %v402_v4 = vpop.permute.xlu1 %401 }
 0x160   : > { %405 = vst.msk [vmem:[%s153_s16] sm:$0xf] %vm404_vm6, %v402_v4 }
 0x16f   : > { %v485_v26 = vpop.permute.xlu0 %484 }
 0x170   : > { %488 = vst.msk [vmem:[%s153_s16] sm:$0xf] %vm487_vm7, %v485_v26 }
 0x17f   : > { %v568_v30 = vpop.permute.xlu1 %567 }
 0x180   : > { %571 = vst.msk [vmem:[%s153_s16] sm:$0xf] %vm570_vm8, %v568_v30 }
 0x18b   : > { %v651_v42 = vpop.permute.xlu0 %650 }
 0x18c   : > { %654 = vst.msk [vmem:[%s153_s16] sm:$0xf] %vm653_vm9, %v651_v42 }
 0x18f   : > { %v734_v28 = vpop.permute.xlu1 %733 }
 0x190   : > { %737 = vst.msk [vmem:[%s153_s16] sm:$0xf] %vm736_vm10, %v734_v28 }
 0x191   : > { %965 = shalt.err (!%p962_p5)
}
 0x192   : > { %s966_s26 = scalar_lea.hbm %s1464_s25, 64  ;;  %s970_s30 = scalar_lea.hbm %s1514_s1, 128 }
 0x193   : > { %p967_p4 = scmp.ne.s32.totalorder %s1464_s25, %s966_s26  ;;  %p971_p12 = scmp.lt.u32.totalorder %s1464_s25, %s1514_s1 }
 0x194   : > { %p972_p1 = scmp.lt.u32.totalorder %s970_s30, %s966_s26  ;;  %p974_p8 = scmp.lt.u32.totalorder %s966_s26, %s1464_s25 }
 0x195   : > { %p968_p7 = pnand %p967_p4, %p1522_p9 }
 0x196   : > { %p973_p3 = por %p972_p1, %p971_p12 }
 0x197   : > { %p969_p10 = pneg %p968_p7 }
 0x198   : > { %p975_p11 = por %p974_p8, %p973_p3 }
 0x19a   : > { %p976_p0 = pnand %p975_p11, %p969_p10 }
 0x19c   : > { %979 = shalt.err (!%p976_p0)
}
 0x19d   : > { %852 = dma.vmem_to_hbm [thread:$0]  (%p1522_p9), %s1466_s22, 64, %s1464_s25, %s739_s28  }
 0x19e PF: > { %s765_s12 = sand.u32 1, %s1014_s6   ;;  %p1523_p6 = scmp.ne.s32.totalorder %s1519_s21, 0 }
 0x19f   : > { %p1524_p13 = scmp.ge.s32.totalorder %s1034_s11, 2  ;;  %s766_s13 = scalar_lea.sflag [#allocation4], %s765_s12 }
 0x1a1   : > { %p859_p2 = pnand %p1524_p13, %p1523_p6 }
 0x1a3   : > { %1009 = dma.done.wait (!%p859_p2), %s766_s13, 64  }
 0x1a4   : > { %1011 = vsyncadd (!%p859_p2), %s766_s13, 4294967232  ;;  %s17_s11 = sadd.s32 1, %s1034_s11   ;;  %s1525_s6 = smov %s1018_s7 }
 0x1a5   : > { %p14_p5 = scmp.ge.s32.totalorder %s17_s11, 4   ;;  %s1526_s7 = smov %s1022_s8 }
 0x1a6   : > { %s1527_s8 = smov %s1114_s20  ;;  %s1528_s9 = smov %s1030_s10 }
 0x1a7   : > { %s1529_s10 = smov %s1531_s14  ;;  %16 = sbr.rel (!%p14_p5) target bundleno = 6 (0x6), region = 69 }
 0x1ae   :  { %771 = vsyncpa [#allocation3], 1 }
 0x1af   :  { %773 = vsyncpa [#allocation3 + $0x1], 1 }
 0x1b0   :  { %774 = vsyncpa [#allocation4], 1 }
 0x1b1   :  { %776 = vsyncpa [#allocation4 + $0x1], 1 }

</bundles_post_ra>
